<compile_context>
chip_gen: v5e
topology: v5e:2x2
jax: 0.10.0
libtpu: 0.0.40
codegen_flags: <defaults>
</compile_context>

<pallas_src>
import math
import functools

import jax
import jax.numpy as jnp
from jax.experimental import pallas as pl
from jax.experimental.pallas import tpu as pltpu


_NEG_PAD = -1.0e30  # padding value for the class axis (softmax-neutral)


def _round_up(x, m):
    return (x + m - 1) // m * m


def _focal_loss_kernel(w_ref, x_ref, t_ref, xa_ref, ta_ref, out_ref,
                       *, alpha, gamma, inv_temperature, batch_size, tile_b):
    TB, C = x_ref.shape
    col = jax.lax.broadcasted_iota(jnp.int32, (TB, C), 1)

    # ---- clean-logit branch: log pt = x_t - m - log(sum exp(x - m)) ----
    x = x_ref[...].astype(jnp.float32)                         # (TB, C)
    t = t_ref[...]                                             # (TB, 1) int32
    m = jnp.max(x, axis=-1, keepdims=True)
    s = jnp.sum(jnp.exp(x - m), axis=-1, keepdims=True)
    x_t = jnp.sum(jnp.where(col == t, x, 0.0), axis=-1, keepdims=True)
    log_pt = x_t - m - jnp.log(s)                              # (TB, 1)

    # ---- adversarial branch (computed after the x branch is fully reduced,
    #      so only one (TB, C) f32 stream is live at a time) ----
    xa = xa_ref[...].astype(jnp.float32) * inv_temperature     # (TB, C)
    ta = ta_ref[...]                                           # (TB, 1) int32
    ma = jnp.max(xa, axis=-1, keepdims=True)
    sa = jnp.sum(jnp.exp(xa - ma), axis=-1, keepdims=True)
    xa_t = jnp.sum(jnp.where(col == ta, xa, 0.0), axis=-1, keepdims=True)
    pt_scale = jnp.exp(xa_t - ma - jnp.log(sa))                # (TB, 1), in [0, 1]

    w = w_ref[0, 0]                                            # scalar from SMEM
    z = jnp.maximum(w * (1.0 - pt_scale), 0.0)                 # clamp ulp negatives
    if float(gamma).is_integer():
        a = jax.lax.integer_pow(z, int(gamma))                 # gamma=2 -> z*z (VPU)
    else:
        a = jnp.power(z, gamma)
    batch_loss = (-alpha) * a * log_pt                         # (TB, 1)
    # TODO(synk): torch code prints `batch_loss` (debug side-effect); omitted here.

    # Mask batch-padding rows out of the reduction.
    rows = jax.lax.broadcasted_iota(jnp.int32, (TB, 1), 0) + pl.program_id(0) * tile_b
    batch_loss = jnp.where(rows < batch_size, batch_loss, 0.0)

    partial = jnp.sum(batch_loss)
    out_ref[...] = jnp.broadcast_to(partial, out_ref.shape).astype(jnp.float32)


def _choose_tile_b(B, C_pad):
    # Keep 2 logit tensors x 2 pipeline buffers x TB x C_pad x 4B <= ~8 MiB.
    budget = 8 * 1024 * 1024
    tb = budget // (2 * 2 * C_pad * 4)
    tb = min(tb, 1024, _round_up(B, 8))
    tb = max(8, (tb // 8) * 8)
    return tb


def focal_loss(inputs, targets, inputs_adv, targets_adv, w,
               *, alpha=1.0, gamma=2.0, temperature=1.0, size_average=True):
    """JAX/Pallas equivalent of FocalLoss.forward. Returns a scalar float32."""
    B, C = inputs.shape

    # Python-scalar branch on w, exactly as in the torch module.
    if w != 1:
        w_eff = 1.0 / (1.0 + math.exp(-10.0 * w + 5.0))
    else:
        w_eff = float(w)
    w_arr = jnp.array([[w_eff]], dtype=jnp.float32)

    # Lane-dense class axis + batch tiling.
    C_pad = _round_up(C, 128)
    TB = _choose_tile_b(B, C_pad)
    B_pad = _round_up(B, TB)
    num_tiles = B_pad // TB

    def _pad_logits(x):
        pb, pc = B_pad - x.shape[0], C_pad - x.shape[1]
        if pb or pc:
            x = jnp.pad(x, ((0, pb), (0, pc)), constant_values=_NEG_PAD)
        return x

    def _pad_targets(t):
        t = t.reshape(-1, 1).astype(jnp.int32)
        pb = B_pad - t.shape[0]
        if pb:
            t = jnp.pad(t, ((0, pb), (0, 0)), constant_values=0)
        return t

    x_p = _pad_logits(inputs)
    xa_p = _pad_logits(inputs_adv)
    t_p = _pad_targets(targets)
    ta_p = _pad_targets(targets_adv)

    kernel = functools.partial(
        _focal_loss_kernel,
        alpha=float(alpha), gamma=float(gamma),
        inv_temperature=float(1.0 / temperature),
        batch_size=int(B), tile_b=int(TB))

    partials = pl.pallas_call(
        kernel,
        out_shape=jax.ShapeDtypeStruct((num_tiles, 8, 128), jnp.float32),
        grid=(num_tiles,),
        in_specs=[
            pl.BlockSpec(memory_space=pltpu.SMEM),              # w scalar
            pl.BlockSpec((TB, C_pad), lambda i: (i, 0)),        # inputs
            pl.BlockSpec((TB, 1), lambda i: (i, 0)),            # targets
            pl.BlockSpec((TB, C_pad), lambda i: (i, 0)),        # inputs_adv
            pl.BlockSpec((TB, 1), lambda i: (i, 0)),            # targets_adv
        ],
        out_specs=pl.BlockSpec((1, 8, 128), lambda i: (i, 0, 0)),
        compiler_params=pltpu.CompilerParams(
            dimension_semantics=("parallel",),
            vmem_limit_bytes=32 * 1024 * 1024),
    )(w_arr, x_p, t_p, xa_p, ta_p)

    total = jnp.sum(partials[:, 0, 0])
    if size_average:
        total = total / jnp.float32(B)
    return total


def _focal_loss_ref(inputs, targets, inputs_adv, targets_adv, w,
                    *, alpha=1.0, gamma=2.0, temperature=1.0, size_average=True):
    B, C = inputs.shape
    if w != 1:
        w = 1.0 / (1.0 + math.exp(-10.0 * w + 5.0))
    p = jax.nn.softmax(inputs.astype(jnp.float32), axis=1)
    pa = jax.nn.softmax(inputs_adv.astype(jnp.float32) / temperature, axis=1)
    pt = jnp.take_along_axis(p, targets.reshape(B, 1), axis=1)
    pt_scale = jnp.take_along_axis(pa, targets_adv.reshape(B, 1), axis=1)
    a = jnp.power(w * (1 - pt_scale), gamma)
    batch_loss = -alpha * a * jnp.log(pt)
    return batch_loss.mean() if size_average else batch_loss.sum()


if __name__ == "__main__":
    B, C = 8, 32
    key = jax.random.PRNGKey(0)
    k1, k2, k3, k4 = jax.random.split(key, 4)

    inputs = jax.random.normal(k1, (B, C), dtype=jnp.float32)
    inputs_adv = jax.random.normal(k2, (B, C), dtype=jnp.float32)
    targets = jax.random.randint(k3, (B,), 0, C, dtype=jnp.int32)
    targets_adv = jax.random.randint(k4, (B,), 0, C, dtype=jnp.int32)
    w = 0.7  # triggers the `w != 1` sigmoid reweighting branch

    loss = focal_loss(inputs, targets, inputs_adv, targets_adv, w)
    loss = jax.block_until_ready(loss)

    ref = _focal_loss_ref(inputs, targets, inputs_adv, targets_adv, w)
    assert jnp.allclose(loss, ref, rtol=1e-5, atol=1e-6), (loss, ref)

    # Also exercise the sum (size_average=False) and temperature != 1 paths.
    loss2 = focal_loss(inputs, targets, inputs_adv, targets_adv, w,
                       temperature=2.0, size_average=False)
    ref2 = _focal_loss_ref(inputs, targets, inputs_adv, targets_adv, w,
                           temperature=2.0, size_average=False)
    assert jnp.allclose(jax.block_until_ready(loss2), ref2, rtol=1e-5, atol=1e-6), (loss2, ref2)

    print("KERNEL_OK")
</pallas_src>

<mosaic_0001>
module attributes {stable_mosaic.version = 11 : i64} {
  func.func @_focal_loss_kernel(%arg0: i32, %arg1: memref<1x1xf32, #tpu.memory_space<smem>>, %arg2: memref<8x128xf32, #tpu.memory_space<vmem>>, %arg3: memref<8x1xi32, #tpu.memory_space<vmem>>, %arg4: memref<8x128xf32, #tpu.memory_space<vmem>>, %arg5: memref<8x1xi32, #tpu.memory_space<vmem>>, %arg6: memref<1x8x128xf32, #tpu.memory_space<vmem>>) attributes {dimension_semantics = [#tpu.dimension_semantics<parallel>], iteration_bounds = array<i64: 1>, scalar_prefetch = 0 : i64, scratch_operands = 0 : i64, tpu.core_type = #tpu.core_type<tc>, window_params = [{transform_indices = @transform_0, window_bounds = array<i64: 1, 1>}, {transform_indices = @transform_1, window_bounds = array<i64: 8, 128>}, {transform_indices = @transform_2, window_bounds = array<i64: 8, 1>}, {transform_indices = @transform_3, window_bounds = array<i64: 8, 128>}, {transform_indices = @transform_4, window_bounds = array<i64: 8, 1>}, {transform_indices = @transform_5, window_bounds = array<i64: 1, 8, 128>}]} {
    %0 = tpu.iota {dimensions = array<i32: 1>} : vector<8x128xi32>
    %c0 = arith.constant 0 : index
    %c0_0 = arith.constant 0 : index
    %1 = vector.load %arg2[%c0, %c0_0] : memref<8x128xf32, #tpu.memory_space<vmem>>, vector<8x128xf32>
    %c0_1 = arith.constant 0 : index
    %c0_2 = arith.constant 0 : index
    %2 = vector.load %arg3[%c0_1, %c0_2] : memref<8x1xi32, #tpu.memory_space<vmem>>, vector<8x1xi32>
    %cst = arith.constant dense<0xFF800000> : vector<8xf32>
    %3 = vector.multi_reduction <maximumf>, %1, %cst [1] : vector<8x128xf32> to vector<8xf32>
    %4 = vector.shape_cast %3 : vector<8xf32> to vector<8x1xf32>
    %5 = vector.broadcast %4 : vector<8x1xf32> to vector<8x128xf32>
    %6 = arith.subf %1, %5 : vector<8x128xf32>
    %7 = math.exp %6 : vector<8x128xf32>
    %cst_3 = arith.constant dense<0.000000e+00> : vector<8xf32>
    %8 = vector.multi_reduction <add>, %7, %cst_3 [1] : vector<8x128xf32> to vector<8xf32>
    %9 = vector.shape_cast %8 : vector<8xf32> to vector<8x1xf32>
    %10 = vector.broadcast %2 : vector<8x1xi32> to vector<8x128xi32>
    %11 = arith.cmpi eq, %0, %10 : vector<8x128xi32>
    %cst_4 = arith.constant 0.000000e+00 : f32
    %12 = vector.broadcast %cst_4 : f32 to vector<8x128xf32>
    %13 = arith.select %11, %1, %12 : vector<8x128xi1>, vector<8x128xf32>
    %cst_5 = arith.constant dense<0.000000e+00> : vector<8xf32>
    %14 = vector.multi_reduction <add>, %13, %cst_5 [1] : vector<8x128xf32> to vector<8xf32>
    %15 = vector.shape_cast %14 : vector<8xf32> to vector<8x1xf32>
    %16 = arith.subf %15, %4 : vector<8x1xf32>
    %17 = math.log %9 : vector<8x1xf32>
    %18 = arith.subf %16, %17 : vector<8x1xf32>
    %c0_6 = arith.constant 0 : index
    %c0_7 = arith.constant 0 : index
    %19 = vector.load %arg4[%c0_6, %c0_7] : memref<8x128xf32, #tpu.memory_space<vmem>>, vector<8x128xf32>
    %cst_8 = arith.constant 1.000000e+00 : f32
    %20 = vector.broadcast %cst_8 : f32 to vector<8x128xf32>
    %21 = arith.mulf %19, %20 : vector<8x128xf32>
    %c0_9 = arith.constant 0 : index
    %c0_10 = arith.constant 0 : index
    %22 = vector.load %arg5[%c0_9, %c0_10] : memref<8x1xi32, #tpu.memory_space<vmem>>, vector<8x1xi32>
    %cst_11 = arith.constant dense<0xFF800000> : vector<8xf32>
    %23 = vector.multi_reduction <maximumf>, %21, %cst_11 [1] : vector<8x128xf32> to vector<8xf32>
    %24 = vector.shape_cast %23 : vector<8xf32> to vector<8x1xf32>
    %25 = vector.broadcast %24 : vector<8x1xf32> to vector<8x128xf32>
    %26 = arith.subf %21, %25 : vector<8x128xf32>
    %27 = math.exp %26 : vector<8x128xf32>
    %cst_12 = arith.constant dense<0.000000e+00> : vector<8xf32>
    %28 = vector.multi_reduction <add>, %27, %cst_12 [1] : vector<8x128xf32> to vector<8xf32>
    %29 = vector.shape_cast %28 : vector<8xf32> to vector<8x1xf32>
    %30 = vector.broadcast %22 : vector<8x1xi32> to vector<8x128xi32>
    %31 = arith.cmpi eq, %0, %30 : vector<8x128xi32>
    %cst_13 = arith.constant 0.000000e+00 : f32
    %32 = vector.broadcast %cst_13 : f32 to vector<8x128xf32>
    %33 = arith.select %31, %21, %32 : vector<8x128xi1>, vector<8x128xf32>
    %cst_14 = arith.constant dense<0.000000e+00> : vector<8xf32>
    %34 = vector.multi_reduction <add>, %33, %cst_14 [1] : vector<8x128xf32> to vector<8xf32>
    %35 = vector.shape_cast %34 : vector<8xf32> to vector<8x1xf32>
    %36 = arith.subf %35, %24 : vector<8x1xf32>
    %37 = math.log %29 : vector<8x1xf32>
    %38 = arith.subf %36, %37 : vector<8x1xf32>
    %39 = math.exp %38 : vector<8x1xf32>
    %c0_15 = arith.constant 0 : index
    %c0_16 = arith.constant 0 : index
    %40 = memref.load %arg1[%c0_15, %c0_16] : memref<1x1xf32, #tpu.memory_space<smem>>
    %cst_17 = arith.constant 1.000000e+00 : f32
    %41 = vector.broadcast %cst_17 : f32 to vector<8x1xf32>
    %42 = arith.subf %41, %39 : vector<8x1xf32>
    %43 = vector.broadcast %40 : f32 to vector<8x1xf32>
    %44 = arith.mulf %43, %42 : vector<8x1xf32>
    %cst_18 = arith.constant 0.000000e+00 : f32
    %45 = vector.broadcast %cst_18 : f32 to vector<8x1xf32>
    %46 = arith.maximumf %44, %45 : vector<8x1xf32>
    %47 = arith.mulf %46, %46 : vector<8x1xf32>
    %cst_19 = arith.constant -1.000000e+00 : f32
    %48 = vector.broadcast %cst_19 : f32 to vector<8x1xf32>
    %49 = arith.mulf %48, %47 : vector<8x1xf32>
    %50 = arith.mulf %49, %18 : vector<8x1xf32>
    %51 = tpu.iota {dimensions = array<i32: 0>} : vector<8x1xi32>
    %c8_i32 = arith.constant 8 : i32
    %52 = arith.muli %arg0, %c8_i32 : i32
    %53 = vector.broadcast %52 : i32 to vector<8x1xi32>
    %54 = arith.addi %51, %53 : vector<8x1xi32>
    %c8_i32_20 = arith.constant 8 : i32
    %55 = vector.broadcast %c8_i32_20 : i32 to vector<8x1xi32>
    %56 = arith.cmpi slt, %54, %55 : vector<8x1xi32>
    %cst_21 = arith.constant 0.000000e+00 : f32
    %57 = vector.broadcast %cst_21 : f32 to vector<8x1xf32>
    %58 = arith.select %56, %50, %57 : vector<8x1xi1>, vector<8x1xf32>
    %59 = vector.shape_cast %58 : vector<8x1xf32> to vector<1x8x1xf32>
    %cst_22 = arith.constant dense<0.000000e+00> : vector<1xf32>
    %60 = vector.multi_reduction <add>, %59, %cst_22 [1, 2] : vector<1x8x1xf32> to vector<1xf32>
    %61 = vector.shape_cast %60 : vector<1xf32> to vector<1x1x1xf32>
    %62 = vector.extract %61[0, 0, 0] : f32 from vector<1x1x1xf32>
    %63 = vector.broadcast %62 : f32 to vector<1x8x128xf32>
    %c0_23 = arith.constant 0 : index
    %c0_24 = arith.constant 0 : index
    %c0_25 = arith.constant 0 : index
    %64 = vector.load %arg6[%c0_23, %c0_24, %c0_25] : memref<1x8x128xf32, #tpu.memory_space<vmem>>, vector<1x8x128xf32>
    tpu.vector_store %arg6[%c0_23, %c0_24, %c0_25], %63 {strides = array<i32>} : memref<1x8x128xf32, #tpu.memory_space<vmem>>, vector<1x8x128xf32>,
    return
  }
  func.func @transform_0(%arg0: i32) -> (i32, i32) {
    %c0_i32 = arith.constant 0 : i32
    %c0_i32_0 = arith.constant 0 : i32
    %c0_i32_1 = arith.constant 0 : i32
    return %c0_i32, %c0_i32_0 : i32, i32
  }
  func.func @transform_1(%arg0: i32) -> (i32, i32) {
    %c0_i32 = arith.constant 0 : i32
    %c0_i32_0 = arith.constant 0 : i32
    return %arg0, %c0_i32 : i32, i32
  }
  func.func @transform_2(%arg0: i32) -> (i32, i32) {
    %c0_i32 = arith.constant 0 : i32
    %c0_i32_0 = arith.constant 0 : i32
    return %arg0, %c0_i32 : i32, i32
  }
  func.func @transform_3(%arg0: i32) -> (i32, i32) {
    %c0_i32 = arith.constant 0 : i32
    %c0_i32_0 = arith.constant 0 : i32
    return %arg0, %c0_i32 : i32, i32
  }
  func.func @transform_4(%arg0: i32) -> (i32, i32) {
    %c0_i32 = arith.constant 0 : i32
    %c0_i32_0 = arith.constant 0 : i32
    return %arg0, %c0_i32 : i32, i32
  }
  func.func @transform_5(%arg0: i32) -> (i32, i32, i32) {
    %c0_i32 = arith.constant 0 : i32
    %c0_i32_0 = arith.constant 0 : i32
    %c0_i32_1 = arith.constant 0 : i32
    return %arg0, %c0_i32, %c0_i32_0 : i32, i32, i32
  }
}

</mosaic_0001>

<bundles_post_ra>
// kernel: tpu_custom_call.1
= control target key start
LH: loop header
LB: loop body
LE: loop exit
PB: predicated region body
PF: predicated region fallthrough
CT: control target
= control target key end

     0   :  { %s202_s0 = inlined_call_operand.<no memory space> [shape: f32[1,1], index: 0, kind: input, shape index: {}]   ;;  %s203_s1 = inlined_call_operand.vmem [shape: f32[8,128], index: 1, kind: input, shape index: {}]   ;;  %s204_s2 = inlined_call_operand.vmem [shape: s32[8,1], index: 2, kind: input, shape index: {}]   ;;  %s205_s3 = inlined_call_operand.vmem [shape: f32[8,128], index: 3, kind: input, shape index: {}]   ;;  %s206_s4 = inlined_call_operand.vmem [shape: s32[8,1], index: 4, kind: input, shape index: {}]   ;;  %s207_s5 = inlined_call_operand.hbm [shape: f32[1,8,128], index: 5, kind: output, shape index: {}]  }
   0x1   :  { %v44_v0 = vld [vmem:[%s205_s3] sm:$0xff] }
   0x2   :  { %v24_v1 = vld [vmem:[%s203_s1] sm:$0xff]  ;;  %46 = vmax.xlane.f32.xlu0 %v44_v0 }
   0x3   :  { %26 = vmax.xlane.f32.xlu1 %v24_v1 }
   0x4   :  { %11 = vsyncpa [#allocation4], 0  ;;  %v152_v2 = vmov 0   ;;  %v45_v3 = vld [vmem:[%s206_s4] sm:$0xff]  ;;  %v22_v10 = vlaneseq  ;;  %v68_v28 = vstv %s202_s0  ;;  %vm81_vm2 = vcmask 7168   ;;  %s153_s0 = smov [#allocation3]  }
   0x5   :  { %114 = vset.pattern.permute.xlu0 %v152_v2  ;;  %115 = vset.pattern.permute.xlu1 %v152_v2  ;;  %v25_v4 = vld [vmem:[%s204_s2] sm:$0xff]  ;;  %s99_s3 = sshll.u32 %s153_s0, 4  ;;  %s101_s27 = sshll.u32 %s207_s5, 4  ;;  %s100_s3 = int_to_ptr.vmem [resolvable:$true] %s99_s3  ;;  %s102_s27 = int_to_ptr.hbm [resolvable:$true] %s101_s27 }
   0x6   :  { %v23_v12 = vand.u32 127, %v22_v10 }
  0x16   :  { %54 = vperm.xlu0 %114, %v45_v3  }
  0x1c   :  { %34 = vperm.xlu1 %115, %v25_v4  }
  0x75   :  { %v47_v5 = vpop.xlane.xlu0 %46 }
  0x76   :  { %v48_v6 = vsub.f32 %v44_v0, %v47_v5  ;;  %v27_v9 = vpop.xlane.xlu1 %26 }
  0x77   :  { %v28_v11 = vsub.f32 %v24_v1, %v27_v9 }
  0x78   :  { %v49_v7 = vmul.f32 1.442695, %v48_v6 }
  0x79   :  { %v29_v13 = vmul.f32 1.442695, %v28_v11 }
  0x7a   :  { %116 = vpow2.f32 %v49_v7 }
  0x7b   :  { %118 = vpow2.f32 %v29_v13 }
  0x80   :  { %v117_v8 = vpop.eup %116 }
  0x81   :  { %51 = vadd.xlane.f32.xlu2 %v117_v8  ;;  %v119_v16 = vpop.eup %118 }
  0x88   :  { %v55_v14 = vpop.permute.xlu0 %54 }
  0x89   :  { %vm56_vm0 = vcmp.eq.s32.totalorder %v23_v12, %v55_v14 }
  0x8a   :  { %v57_v15 = vsel %vm56_vm0, %v44_v0, 0.0 }
  0x8b   :  { %58 = vadd.xlane.f32.xlu2 %v57_v15 }
  0x8e   :  { %v35_v17 = vpop.permute.xlu1 %34 }
  0x8f   :  { %vm36_vm1 = vcmp.eq.s32.totalorder %v23_v12, %v35_v17 }
  0x90   :  { %v37_v18 = vsel %vm36_vm1, %v24_v1, 0.0 }
  0x93   :  { %31 = vadd.xlane.f32.xlu2 %v119_v16 }
  0x9b   :  { %38 = vadd.xlane.f32.xlu2 %v37_v18 }
  0xf4   :  { %v52_v19 = vpop.xlane.xlu2 %51 }
  0xf5   :  { %120 = vlog2.f32 %v52_v19 }
  0xfb   :  { %v121_v20 = vpop.eup %120 }
  0xfc   :  { %v62_v22 = vmul.f32 0.6931472, %v121_v20 }
  0xfe   :  { %v59_v21 = vpop.xlane.xlu2 %58 }
  0xff   :  { %v60_v23 = vsub.f32 %v59_v21, %v47_v5 }
 0x101   :  { %v63_v24 = vsub.f32 %v60_v23, %v62_v22 }
 0x103   :  { %v64_v25 = vmul.f32 1.442695, %v63_v24 }
 0x105   :  { %122 = vpow2.f32 %v64_v25 }
 0x106   :  { %v32_v26 = vpop.xlane.xlu2 %31 }
 0x107   :  { %124 = vlog2.f32 %v32_v26 }
 0x10b   :  { %v123_v27 = vpop.eup %122 }
 0x10c   :  { %v67_v29 = vsub.f32 1.0, %v123_v27 }
 0x10d   :  { %v125_v30 = vpop.eup %124 }
 0x10e   :  { %v39_v31 = vpop.xlane.xlu2 %38  ;;  %v69_v32 = vmul.f32 %v68_v28, %v67_v29  ;;  %v42_v33 = vmul.f32 0.6931472, %v125_v30 }
 0x10f   :  { %v40_v34 = vsub.f32 %v39_v31, %v27_v9 }
 0x110   :  { %v70_v35 = vmax.f32 %v69_v32, 0.0 }
 0x111   :  { %v43_v37 = vsub.f32 %v40_v34, %v42_v33 }
 0x112   :  { %v71_v36 = vmul.f32 %v70_v35, %v70_v35 }
 0x114   :  { %v72_v38 = vmul.f32 -1.0, %v71_v36 }
 0x116   :  { %v73_v39 = vmul.f32 %v72_v38, %v43_v37 }
 0x118   :  { %v82_v40 = vsel %vm81_vm2, %v73_v39, 0.0 }
 0x119   :  { %83 = vadd.xlane.f32.xlu2 %v82_v40 }
 0x18c   :  { %v84_v41 = vpop.xlane.xlu2 %83 }
 0x18d   :  { %v85_v42 = vrot.slane %v84_v41, 4 }
 0x18f   :  { %v86_v43 = vadd.f32 %v85_v42, %v84_v41 }
 0x191   :  { %v87_v44 = vrot.slane %v86_v43, 2 }
 0x193   :  { %v88_v45 = vadd.f32 %v87_v44, %v86_v43 }
 0x195   :  { %v89_v46 = vrot.slane %v88_v45, 1 }
 0x197   :  { %v90_v47 = vadd.f32 %v89_v46, %v88_v45 }
 0x199   :  { %110 = vpush %v90_v47 }
 0x1ca   :  { %s111_s28 = spop %110 }
 0x1cb   :  { %v92_v48 = vstv %s111_s28 }
 0x1cc   :  { %93 = vst [vmem:[#allocation3] sm:$0xff] %v92_v48 }
 0x1cd   :  { %104 = dma.vmem_to_hbm [thread:$0]  %s100_s3, 128, %s102_s27, [#allocation4]  }
 0x1ce   :  { %150 = dma.done.wait [#allocation4], 128  }
 0x1cf   :  { %151 = vsyncadd [#allocation4], 4294967168 }
 0x1d0   :  { %109 = vsyncpa [#allocation4], 1 }

</bundles_post_ra>
